<compile_context>
chip_gen: v7x
topology: tpu7x:2x2x1
jax: 0.10.0
libtpu: 0.0.40
codegen_flags: <defaults>
</compile_context>

<pallas_src>
import math
from functools import partial

import jax
import jax.numpy as jnp
from jax.experimental import pallas as pl
from jax.experimental.pallas import tpu as pltpu

# ----------------------------- configuration --------------------------------
NUM_CLASSES = 5                  # includes background class 0
POOLED = 4                       # RoIAlignRotated output size P x P
SAMPLING_RATIO = 2               # bilinear samples per bin edge (averaged)
REPR_SIZE = 128                  # TwoMLPHead representation size (lane-dense)
BBOX_REG_WEIGHTS = (10.0, 10.0, 5.0, 5.0, 10.0)
SCORE_THRESH = 0.05
DETECTIONS_PER_IMG = 10
BBOX_CLAMP = math.log(1000.0 / 16.0)
OUT_LANES = 128                  # fused output slab width (scores + decoded boxes)


def _select_tm(n):
    """Row-tile choice: 256 fills the v6e/v7x 256-wide MXU for big RoI counts,
    64 keeps grid >= 2 (both v7x TensorCores busy) for tiny counts.
    TODO(synk): prefer TM=128 on v5e (4x128 MXU) even for large N."""
    if n >= 512:
        return 256
    if n >= 256:
        return 128
    return 64


# ---------------- Pallas kernel: fused box_head + predictor + decode --------
def _head_decode_kernel(x_ref, props_ref, w6_ref, b6_ref, w7_ref, b7_ref,
                        wcr_ref, bcr_ref, out_ref):
    # --- box_head: fc6 + ReLU, fc7 + ReLU (bf16 MXU matmuls, f32 accumulate) ---
    x = x_ref[...]
    h = jnp.dot(x, w6_ref[...], preferred_element_type=jnp.float32) + b6_ref[...]
    h = jnp.maximum(h, 0.0)
    h = jnp.dot(h.astype(jnp.bfloat16), w7_ref[...],
                preferred_element_type=jnp.float32) + b7_ref[...]
    h = jnp.maximum(h, 0.0)

    # --- box_predictor: one lane-dense (TM, 128) slab: [logits | regress | pad] ---
    # 1/BBOX_REG_WEIGHTS is already folded into the regression columns of wcr/bcr.
    pred = jnp.dot(h.astype(jnp.bfloat16), wcr_ref[...],
                   preferred_element_type=jnp.float32) + bcr_ref[...]

    lane = jax.lax.broadcasted_iota(jnp.int32, (1, OUT_LANES), 1)
    is_cls = lane < NUM_CLASSES
    is_reg = (lane >= NUM_CLASSES) & (lane < NUM_CLASSES + NUM_CLASSES * 5)
    comp = jnp.mod(lane - NUM_CLASSES, 5)          # 0..4 = (dx, dy, dw, dh, da)
    is_exp = is_reg & ((comp == 2) | (comp == 3))

    # --- softmax over the class lanes (matches F.softmax(class_logits, -1)) ---
    logits_m = jnp.where(is_cls, pred, -1e30)
    m = jnp.max(logits_m, axis=-1, keepdims=True)
    e = jnp.exp(logits_m - m)                      # zero on non-class lanes
    s = jnp.sum(e, axis=-1, keepdims=True)
    scores = e / s

    # --- XYWHA delta decode; mul/add tables built from the (TM, 8) proposal tile ---
    props = props_ref[...]                         # [cx, cy, w, h, a, 0, 0, 0]
    px = props[:, 0:1]
    py = props[:, 1:2]
    pw = props[:, 2:3]
    ph = props[:, 3:4]
    pa = props[:, 4:5]
    pmul = jnp.where((comp == 0) | (comp == 2), pw,
           jnp.where((comp == 1) | (comp == 3), ph, 1.0))
    padd = jnp.where(comp == 0, px,
           jnp.where(comp == 1, py,
           jnp.where(comp == 4, pa, 0.0)))

    dec_lin = pmul * pred + padd                                   # cx, cy, angle lanes
    dec_exp = pmul * jnp.exp(jnp.minimum(pred, BBOX_CLAMP))        # w, h lanes
    decoded = jnp.where(is_exp, dec_exp, dec_lin)

    out_ref[...] = jnp.where(is_cls, scores, jnp.where(is_reg, decoded, 0.0))


def run_head_decode(x, props8, params, tm):
    """x: (Npad, F) bf16 flattened pooled features (channel-minor); props8: (Npad, 8)
    f32 [cx, cy, w, h, a, 0, 0, 0].  Returns scores (Npad, NC), boxes (Npad, NC, 5)."""
    npad, feat = x.shape
    assert npad % tm == 0
    full = lambda a: pl.BlockSpec(a.shape, lambda i: (0,) * a.ndim)
    w6, b6, w7, b7, wcr, bcr = (params[k] for k in
                                ("w6", "b6", "w7", "b7", "wcr", "bcr"))

    matmul_flops = 2 * npad * (feat * REPR_SIZE + REPR_SIZE * REPR_SIZE
                               + REPR_SIZE * OUT_LANES)
    bytes_accessed = (npad * feat * 2 + npad * 8 * 4 + npad * OUT_LANES * 4
                      + (feat * REPR_SIZE + REPR_SIZE * REPR_SIZE
                         + REPR_SIZE * OUT_LANES) * 2
                      + (2 * REPR_SIZE + OUT_LANES) * 4)
    cost = pl.CostEstimate(flops=matmul_flops,
                           transcendentals=2 * npad * OUT_LANES,
                           bytes_accessed=bytes_accessed)

    out = pl.pallas_call(
        _head_decode_kernel,
        out_shape=jax.ShapeDtypeStruct((npad, OUT_LANES), jnp.float32),
        grid=(npad // tm,),
        in_specs=[
            pl.BlockSpec((tm, feat), lambda i: (i, 0)),
            pl.BlockSpec((tm, 8), lambda i: (i, 0)),
            full(w6), full(b6), full(w7), full(b7), full(wcr), full(bcr),
        ],
        out_specs=pl.BlockSpec((tm, OUT_LANES), lambda i: (i, 0)),
        compiler_params=pltpu.CompilerParams(
            dimension_semantics=("parallel",),
            vmem_limit_bytes=32 * 1024 * 1024),
        cost_estimate=cost,
    )(x, props8, w6, b6, w7, b7, wcr, bcr)
    scores = out[:, :NUM_CLASSES]
    boxes = out[:, NUM_CLASSES:NUM_CLASSES + NUM_CLASSES * 5]
    return scores, boxes.reshape(npad, NUM_CLASSES, 5)


# ---------------- rotated RoI-align as per-image interpolation matmul -------
def roi_align_rotated(feat_nhwc, proposals, spatial_scale,
                      pooled=POOLED, sampling_ratio=SAMPLING_RATIO):
    """feat_nhwc: (B, H, W, C); proposals: (B, n_max, 5) xywha in image coords.
    Returns (B, n_max, P*P*C) pooled features flattened channel-minor
    ((py, px, c) order -- w6's rows are permuted offline to match)."""
    B, H, W, C = feat_nhwc.shape
    n_max = proposals.shape[1]
    HW = H * W
    P, sr = pooled, sampling_ratio
    S = P * sr

    cx = proposals[..., 0] * spatial_scale
    cy = proposals[..., 1] * spatial_scale
    w = proposals[..., 2] * spatial_scale
    h = proposals[..., 3] * spatial_scale
    a = proposals[..., 4]
    cos_a = jnp.cos(a)[..., None, None]
    sin_a = jnp.sin(a)[..., None, None]

    frac = (jnp.arange(S, dtype=jnp.float32) + 0.5) / S - 0.5      # (-0.5, 0.5)
    xl = w[..., None, None] * frac[None, None, None, :]            # (B, n, 1, S)
    yl = h[..., None, None] * frac[None, None, :, None]            # (B, n, S, 1)
    xs = cx[..., None, None] + xl * cos_a - yl * sin_a             # (B, n, S, S)
    ys = cy[..., None, None] + xl * sin_a + yl * cos_a

    # reference keeps samples on the far border (skip only x > W / y > H)
    inside = ((xs >= -1.0) & (xs <= W) & (ys >= -1.0) & (ys <= H)).astype(jnp.float32)
    xs_c = jnp.clip(xs, 0.0, W - 1.0)
    ys_c = jnp.clip(ys, 0.0, H - 1.0)
    x0 = jnp.floor(xs_c)
    y0 = jnp.floor(ys_c)
    lx = xs_c - x0
    ly = ys_c - y0
    x0i = x0.astype(jnp.int32)
    x1i = jnp.minimum(x0i + 1, W - 1)
    y0i = y0.astype(jnp.int32)
    y1i = jnp.minimum(y0i + 1, H - 1)

    corner_idx = (y0i * W + x0i, y0i * W + x1i, y1i * W + x0i, y1i * W + x1i)
    inv = inside * (1.0 / float(sr * sr))          # fold the sr*sr bin average in
    corner_w = ((1.0 - ly) * (1.0 - lx) * inv, (1.0 - ly) * lx * inv,
                ly * (1.0 - lx) * inv, ly * lx * inv)

    cols = jnp.arange(HW, dtype=jnp.int32)
    # Accumulate corner contributions at bin granularity: (B, n, P*P, HW); the
    # intermediate is sr^2 smaller than the full sample-grid one-hot and no
    # separate reshape/mean pass over it is needed.
    A = jnp.zeros((B, n_max, P * P, HW), jnp.float32)
    for idx, wgt in zip(corner_idx, corner_w):
        idx_b = idx.reshape(B, n_max, P, sr, P, sr)
        wgt_b = wgt.reshape(B, n_max, P, sr, P, sr)
        for sy in range(sr):
            for sx in range(sr):
                idx_q = idx_b[:, :, :, sy, :, sx].reshape(B, n_max, P * P)
                wgt_q = wgt_b[:, :, :, sy, :, sx].reshape(B, n_max, P * P)
                A = A + (idx_q[..., None] == cols) * wgt_q[..., None]

    # per-image batched matmul on the bf16 MXU path; no per-RoI feature replication
    A = A.reshape(B, n_max * P * P, HW).astype(jnp.bfloat16)
    feat_flat = feat_nhwc.reshape(B, HW, C).astype(jnp.bfloat16)
    pooled_qc = jnp.einsum("bqh,bhc->bqc", A, feat_flat,
                           preferred_element_type=jnp.float32)      # (B, n*P*P, C)
    return pooled_qc.reshape(B, n_max, P * P * C)


# --------------------------- batched postprocess -----------------------------
def postprocess_batched(scores, boxes, proposal_mask):
    """scores: (B*n_max, NC), boxes: (B*n_max, NC, 5), proposal_mask: (B, n_max)."""
    B, n_max = proposal_mask.shape
    nc = NUM_CLASSES
    scores = scores.reshape(B, n_max, nc)[:, :, 1:]               # drop background
    boxes = boxes.reshape(B, n_max, nc, 5)[:, :, 1:, :]
    labels = jnp.broadcast_to(
        jnp.arange(1, nc, dtype=jnp.int32)[None, None, :], (B, n_max, nc - 1))
    M = n_max * (nc - 1)
    scores = scores.reshape(B, M)
    boxes = boxes.reshape(B, M, 5)
    labels = labels.reshape(B, M)
    valid = jnp.broadcast_to(proposal_mask[:, :, None], (B, n_max, nc - 1)).reshape(B, M)

    keep = valid & (scores > SCORE_THRESH) & (boxes[..., 2] >= 0.01) & (boxes[..., 3] >= 0.01)
    masked = jnp.where(keep, scores, -jnp.inf)
    # TODO(synk): batched_nms_rotated (rotated-IoU NMS) has no clean Pallas
    # equivalent; return top-K by score after threshold / small-box filtering.
    k = min(DETECTIONS_PER_IMG, M)
    top_scores, top_idx = jax.lax.top_k(masked, k)                # (B, k)
    top_boxes = jnp.take_along_axis(boxes, top_idx[..., None], axis=1)
    top_labels = jnp.take_along_axis(labels, top_idx, axis=1)
    det_valid = jnp.isfinite(top_scores)
    top_scores = jnp.where(det_valid, top_scores, 0.0)
    top_boxes = jnp.where(det_valid[..., None], top_boxes, 0.0)
    top_labels = jnp.where(det_valid, top_labels, 0)
    return top_boxes, top_scores, top_labels, det_valid


# --------------------------- full forward (eval path) -----------------------
@partial(jax.jit, static_argnames=("image_h",))
def _forward_core(feat, proposals, proposal_mask, params, image_h):
    """feat: (B, C, Hf, Wf) NCHW; proposals: (B, n_max, 5); proposal_mask: (B, n_max)."""
    B, C, Hf, Wf = feat.shape
    spatial_scale = Hf / float(image_h)
    n_max = proposals.shape[1]
    N = B * n_max

    props = proposals.astype(jnp.float32)
    feat_nhwc = jnp.transpose(feat, (0, 2, 3, 1))                 # channels lane-dense

    x = roi_align_rotated(feat_nhwc, props, spatial_scale)        # (B, n_max, P*P*C)
    x = x.reshape(N, -1)

    tm = _select_tm(N)
    npad = max(2 * tm, ((N + tm - 1) // tm) * tm)                 # grid >= 2 (v7x 2 TCs)
    x = jnp.pad(x, ((0, npad - N), (0, 0))).astype(jnp.bfloat16)
    props8 = jnp.pad(props.reshape(N, 5), ((0, npad - N), (0, 3)))  # (npad, 8) f32

    scores, boxes = run_head_decode(x, props8, params, tm)        # fused Pallas kernel
    scores = scores[:N]
    boxes = boxes[:N]
    return postprocess_batched(scores, boxes, proposal_mask)


def rotated_roi_head_forward(features, proposals, image_shapes, params):
    """features: {'0': (B, C, H, W)}; proposals: list of (n_i, 5) xywha boxes in
    image coordinates; image_shapes: list of (H_img, W_img)."""
    feat = features["0"]
    B = feat.shape[0]
    counts = [int(p.shape[0]) for p in proposals]
    n_max = max(counts)
    props = jnp.stack(
        [jnp.pad(p.astype(jnp.float32), ((0, n_max - p.shape[0]), (0, 0)))
         for p in proposals], axis=0)                              # (B, n_max, 5)
    mask = jnp.stack([jnp.arange(n_max) < c for c in counts], axis=0)

    boxes, scores, labels, _ = _forward_core(feat, props, mask, params,
                                             int(image_shapes[0][0]))
    result = [{"oboxes": boxes[i], "labels": labels[i], "scores": scores[i]}
              for i in range(B)]
    losses = {"loss_classifier": jnp.array(0.0),
              "loss_obox_coord_reg": jnp.array(0.0),
              "loss_obox_angle_reg": jnp.array(0.0)}
    return result, losses


# ------------------------------ parameter init ------------------------------
def init_params(key, in_channels, pooled, repr_size, num_classes):
    """Builds kernel-ready parameters:
      * w6 rows permuted from the reference (C, P, P)-major flatten order to the
        kernel's channel-minor (P*P, C) pooled layout.
      * 1/BBOX_REG_WEIGHTS folded into the regression columns of wcr / bcr.
      * cls + bbox weights concatenated and zero-padded to one lane-dense
        (repr, 128) matrix."""
    ks = jax.random.split(key, 4)
    scale = 0.02
    in_features = in_channels * pooled * pooled
    # reference layout weights (rows ordered c-major like torch.flatten of (C,P,P))
    w6_ref = scale * jax.random.normal(ks[0], (in_features, repr_size), jnp.float32)
    w7 = scale * jax.random.normal(ks[1], (repr_size, repr_size), jnp.float32)
    wc = scale * jax.random.normal(ks[2], (repr_size, num_classes), jnp.float32)
    wr = scale * jax.random.normal(ks[3], (repr_size, num_classes * 5), jnp.float32)

    # offline row permutation of w6: (c, q) -> (q, c) flatten order
    w6 = (w6_ref.reshape(in_channels, pooled * pooled, repr_size)
          .transpose(1, 0, 2).reshape(in_features, repr_size))

    # fold 1/reg_weights into the regression columns (static scaling)
    inv_rw = jnp.tile(1.0 / jnp.asarray(BBOX_REG_WEIGHTS, jnp.float32), num_classes)
    wr = wr * inv_rw[None, :]
    bc = jnp.zeros((num_classes,), jnp.float32)
    br = jnp.zeros((num_classes * 5,), jnp.float32) * inv_rw

    wcr = jnp.concatenate([wc, wr], axis=1)                        # (repr, 30)
    wcr = jnp.pad(wcr, ((0, 0), (0, OUT_LANES - wcr.shape[1])))    # lane-dense (repr, 128)
    bcr = jnp.concatenate([bc, br])
    bcr = jnp.pad(bcr, (0, OUT_LANES - bcr.shape[0]))[None, :]     # (1, 128)

    return {
        "w6": w6.astype(jnp.bfloat16), "b6": jnp.zeros((1, repr_size), jnp.float32),
        "w7": w7.astype(jnp.bfloat16), "b7": jnp.zeros((1, repr_size), jnp.float32),
        "wcr": wcr.astype(jnp.bfloat16), "bcr": bcr.astype(jnp.float32),
    }


# ----------------------------------- main ------------------------------------
if __name__ == "__main__":
    key = jax.random.PRNGKey(0)
    k_feat, k_ctr, k_wh, k_ang, k_par = jax.random.split(key, 5)

    B, CF, HF, WF = 2, 8, 16, 16
    IMG_H, IMG_W = 64, 64
    N_PER_IMG = 12

    features = {"0": jax.random.normal(k_feat, (B, CF, HF, WF), jnp.float32)}
    image_shapes = [(IMG_H, IMG_W)] * B

    centers = jax.random.uniform(k_ctr, (B, N_PER_IMG, 2), minval=8.0, maxval=56.0)
    wh = jax.random.uniform(k_wh, (B, N_PER_IMG, 2), minval=6.0, maxval=24.0)
    ang = jax.random.uniform(k_ang, (B, N_PER_IMG, 1), minval=-0.6, maxval=0.6)
    proposals = [jnp.concatenate([centers[i], wh[i], ang[i]], axis=1) for i in range(B)]

    params = init_params(k_par, CF, POOLED, REPR_SIZE, NUM_CLASSES)

    result, losses = rotated_roi_head_forward(features, proposals, image_shapes, params)
    for r in result:
        jax.block_until_ready(r["oboxes"])
        jax.block_until_ready(r["scores"])
        jax.block_until_ready(r["labels"])
    jax.block_until_ready(losses["loss_classifier"])
    print("KERNEL_OK")
</pallas_src>

<mosaic_0001>
module attributes {stable_mosaic.version = 11 : i64} {
  func.func @_head_decode_kernel(%arg0: i32, %arg1: memref<64x128xbf16, #tpu.memory_space<vmem>>, %arg2: memref<64x8xf32, #tpu.memory_space<vmem>>, %arg3: memref<128x128xbf16, #tpu.memory_space<vmem>>, %arg4: memref<1x128xf32, #tpu.memory_space<vmem>>, %arg5: memref<128x128xbf16, #tpu.memory_space<vmem>>, %arg6: memref<1x128xf32, #tpu.memory_space<vmem>>, %arg7: memref<128x128xbf16, #tpu.memory_space<vmem>>, %arg8: memref<1x128xf32, #tpu.memory_space<vmem>>, %arg9: memref<64x128xf32, #tpu.memory_space<vmem>>) attributes {dimension_semantics = [#tpu.dimension_semantics<parallel>], iteration_bounds = array<i64: 2>, scalar_prefetch = 0 : i64, scratch_operands = 0 : i64, tpu.core_type = #tpu.core_type<tc>, window_params = [{transform_indices = @transform_0, window_bounds = array<i64: 64, 128>}, {transform_indices = @transform_1, window_bounds = array<i64: 64, 8>}, {pipeline_mode = #tpu.pipeline_mode<synchronous>, transform_indices = @transform_2, window_bounds = array<i64: 128, 128>}, {pipeline_mode = #tpu.pipeline_mode<synchronous>, transform_indices = @transform_3, window_bounds = array<i64: 1, 128>}, {pipeline_mode = #tpu.pipeline_mode<synchronous>, transform_indices = @transform_4, window_bounds = array<i64: 128, 128>}, {pipeline_mode = #tpu.pipeline_mode<synchronous>, transform_indices = @transform_5, window_bounds = array<i64: 1, 128>}, {pipeline_mode = #tpu.pipeline_mode<synchronous>, transform_indices = @transform_6, window_bounds = array<i64: 128, 128>}, {pipeline_mode = #tpu.pipeline_mode<synchronous>, transform_indices = @transform_7, window_bounds = array<i64: 1, 128>}, {transform_indices = @transform_8, window_bounds = array<i64: 64, 128>}]} {
    %c0 = arith.constant 0 : index
    %c0_0 = arith.constant 0 : index
    %0 = vector.load %arg1[%c0, %c0_0] : memref<64x128xbf16, #tpu.memory_space<vmem>>, vector<64x128xbf16>
    %c0_1 = arith.constant 0 : index
    %c0_2 = arith.constant 0 : index
    %1 = vector.load %arg3[%c0_1, %c0_2] : memref<128x128xbf16, #tpu.memory_space<vmem>>, vector<128x128xbf16>
    %cst = arith.constant dense<0.000000e+00> : vector<64x128xf32>
    %2 = tpu.matmul %0, %1, %cst {dimension_numbers = #tpu.dot_dimension_numbers<[1], [0], [0], [1], [0, 0, 1, 1], [], []>} : vector<64x128xbf16>, vector<128x128xbf16>, vector<64x128xf32> -> vector<64x128xf32>
    %c0_3 = arith.constant 0 : index
    %c0_4 = arith.constant 0 : index
    %3 = vector.load %arg4[%c0_3, %c0_4] : memref<1x128xf32, #tpu.memory_space<vmem>>, vector<1x128xf32>
    %4 = vector.broadcast %3 : vector<1x128xf32> to vector<64x128xf32>
    %5 = arith.addf %2, %4 : vector<64x128xf32>
    %cst_5 = arith.constant 0.000000e+00 : f32
    %6 = vector.broadcast %cst_5 : f32 to vector<64x128xf32>
    %7 = arith.maximumf %5, %6 : vector<64x128xf32>
    %8 = arith.truncf %7 : vector<64x128xf32> to vector<64x128xbf16>
    %c0_6 = arith.constant 0 : index
    %c0_7 = arith.constant 0 : index
    %9 = vector.load %arg5[%c0_6, %c0_7] : memref<128x128xbf16, #tpu.memory_space<vmem>>, vector<128x128xbf16>
    %cst_8 = arith.constant dense<0.000000e+00> : vector<64x128xf32>
    %10 = tpu.matmul %8, %9, %cst_8 {dimension_numbers = #tpu.dot_dimension_numbers<[1], [0], [0], [1], [0, 0, 1, 1], [], []>} : vector<64x128xbf16>, vector<128x128xbf16>, vector<64x128xf32> -> vector<64x128xf32>
    %c0_9 = arith.constant 0 : index
    %c0_10 = arith.constant 0 : index
    %11 = vector.load %arg6[%c0_9, %c0_10] : memref<1x128xf32, #tpu.memory_space<vmem>>, vector<1x128xf32>
    %12 = vector.broadcast %11 : vector<1x128xf32> to vector<64x128xf32>
    %13 = arith.addf %10, %12 : vector<64x128xf32>
    %cst_11 = arith.constant 0.000000e+00 : f32
    %14 = vector.broadcast %cst_11 : f32 to vector<64x128xf32>
    %15 = arith.maximumf %13, %14 : vector<64x128xf32>
    %16 = arith.truncf %15 : vector<64x128xf32> to vector<64x128xbf16>
    %c0_12 = arith.constant 0 : index
    %c0_13 = arith.constant 0 : index
    %17 = vector.load %arg7[%c0_12, %c0_13] : memref<128x128xbf16, #tpu.memory_space<vmem>>, vector<128x128xbf16>
    %cst_14 = arith.constant dense<0.000000e+00> : vector<64x128xf32>
    %18 = tpu.matmul %16, %17, %cst_14 {dimension_numbers = #tpu.dot_dimension_numbers<[1], [0], [0], [1], [0, 0, 1, 1], [], []>} : vector<64x128xbf16>, vector<128x128xbf16>, vector<64x128xf32> -> vector<64x128xf32>
    %c0_15 = arith.constant 0 : index
    %c0_16 = arith.constant 0 : index
    %19 = vector.load %arg8[%c0_15, %c0_16] : memref<1x128xf32, #tpu.memory_space<vmem>>, vector<1x128xf32>
    %20 = vector.broadcast %19 : vector<1x128xf32> to vector<64x128xf32>
    %21 = arith.addf %18, %20 : vector<64x128xf32>
    %22 = tpu.iota {dimensions = array<i32: 1>} : vector<1x128xi32>
    %c5_i32 = arith.constant 5 : i32
    %23 = vector.broadcast %c5_i32 : i32 to vector<1x128xi32>
    %24 = arith.cmpi slt, %22, %23 : vector<1x128xi32>
    %c5_i32_17 = arith.constant 5 : i32
    %25 = vector.broadcast %c5_i32_17 : i32 to vector<1x128xi32>
    %26 = arith.cmpi sge, %22, %25 : vector<1x128xi32>
    %c30_i32 = arith.constant 30 : i32
    %27 = vector.broadcast %c30_i32 : i32 to vector<1x128xi32>
    %28 = arith.cmpi slt, %22, %27 : vector<1x128xi32>
    %29 = arith.andi %26, %28 : vector<1x128xi1>
    %c5_i32_18 = arith.constant 5 : i32
    %30 = vector.broadcast %c5_i32_18 : i32 to vector<1x128xi32>
    %31 = arith.subi %22, %30 : vector<1x128xi32>
    %c5_i32_19 = arith.constant 5 : i32
    %c0_i32 = arith.constant 0 : i32
    %32 = arith.cmpi eq, %c5_i32_19, %c0_i32 : i32
    %c1_i32 = arith.constant 1 : i32
    %33 = arith.select %32, %c1_i32, %c5_i32_19 : i32
    %34 = vector.broadcast %33 : i32 to vector<1x128xi32>
    %35 = arith.remsi %31, %34 : vector<1x128xi32>
    %c0_i32_20 = arith.constant 0 : i32
    %36 = vector.broadcast %c0_i32_20 : i32 to vector<1x128xi32>
    %37 = arith.cmpi ne, %35, %36 : vector<1x128xi32>
    %c0_i32_21 = arith.constant 0 : i32
    %38 = vector.broadcast %c0_i32_21 : i32 to vector<1x128xi32>
    %39 = arith.cmpi slt, %35, %38 : vector<1x128xi32>
    %c0_i32_22 = arith.constant 0 : i32
    %40 = arith.cmpi slt, %33, %c0_i32_22 : i32
    %41 = vector.broadcast %40 : i1 to vector<1x128xi1>
    %42 = vector.broadcast %41 : vector<1x128xi1> to vector<1x128xi1>
    %43 = arith.xori %39, %42 : vector<1x128xi1>
    %44 = arith.andi %43, %37 : vector<1x128xi1>
    %45 = vector.broadcast %33 : i32 to vector<1x128xi32>
    %46 = arith.addi %35, %45 : vector<1x128xi32>
    %47 = arith.select %44, %46, %35 : vector<1x128xi1>, vector<1x128xi32>
    %c2_i32 = arith.constant 2 : i32
    %48 = vector.broadcast %c2_i32 : i32 to vector<1x128xi32>
    %49 = arith.cmpi eq, %47, %48 : vector<1x128xi32>
    %c3_i32 = arith.constant 3 : i32
    %50 = vector.broadcast %c3_i32 : i32 to vector<1x128xi32>
    %51 = arith.cmpi eq, %47, %50 : vector<1x128xi32>
    %52 = arith.ori %49, %51 : vector<1x128xi1>
    %53 = arith.andi %29, %52 : vector<1x128xi1>
    %cst_23 = arith.constant -1.000000e+30 : f32
    %54 = vector.shape_cast %24 : vector<1x128xi1> to vector<1x128xi1>
    %55 = vector.broadcast %54 : vector<1x128xi1> to vector<64x128xi1>
    %56 = vector.broadcast %cst_23 : f32 to vector<64x128xf32>
    %57 = arith.select %55, %21, %56 : vector<64x128xi1>, vector<64x128xf32>
    %cst_24 = arith.constant dense<0xFF800000> : vector<64xf32>
    %58 = vector.multi_reduction <maximumf>, %57, %cst_24 [1] : vector<64x128xf32> to vector<64xf32>
    %59 = vector.shape_cast %58 : vector<64xf32> to vector<64x1xf32>
    %60 = vector.broadcast %59 : vector<64x1xf32> to vector<64x128xf32>
    %61 = arith.subf %57, %60 : vector<64x128xf32>
    %62 = math.exp %61 : vector<64x128xf32>
    %cst_25 = arith.constant dense<0.000000e+00> : vector<64xf32>
    %63 = vector.multi_reduction <add>, %62, %cst_25 [1] : vector<64x128xf32> to vector<64xf32>
    %64 = vector.shape_cast %63 : vector<64xf32> to vector<64x1xf32>
    %65 = vector.broadcast %64 : vector<64x1xf32> to vector<64x128xf32>
    %66 = arith.divf %62, %65 : vector<64x128xf32>
    %c0_26 = arith.constant 0 : index
    %c0_27 = arith.constant 0 : index
    %67 = vector.load %arg2[%c0_26, %c0_27] : memref<64x8xf32, #tpu.memory_space<vmem>>, vector<64x8xf32>
    %68 = vector.extract_strided_slice %67 {offsets = [0, 0], sizes = [64, 1], strides = [1, 1]} : vector<64x8xf32> to vector<64x1xf32>
    %69 = vector.extract_strided_slice %67 {offsets = [0, 1], sizes = [64, 1], strides = [1, 1]} : vector<64x8xf32> to vector<64x1xf32>
    %70 = vector.extract_strided_slice %67 {offsets = [0, 2], sizes = [64, 1], strides = [1, 1]} : vector<64x8xf32> to vector<64x1xf32>
    %71 = vector.extract_strided_slice %67 {offsets = [0, 3], sizes = [64, 1], strides = [1, 1]} : vector<64x8xf32> to vector<64x1xf32>
    %72 = vector.extract_strided_slice %67 {offsets = [0, 4], sizes = [64, 1], strides = [1, 1]} : vector<64x8xf32> to vector<64x1xf32>
    %c0_i32_28 = arith.constant 0 : i32
    %73 = vector.broadcast %c0_i32_28 : i32 to vector<1x128xi32>
    %74 = arith.cmpi eq, %47, %73 : vector<1x128xi32>
    %c2_i32_29 = arith.constant 2 : i32
    %75 = vector.broadcast %c2_i32_29 : i32 to vector<1x128xi32>
    %76 = arith.cmpi eq, %47, %75 : vector<1x128xi32>
    %77 = arith.ori %74, %76 : vector<1x128xi1>
    %c1_i32_30 = arith.constant 1 : i32
    %78 = vector.broadcast %c1_i32_30 : i32 to vector<1x128xi32>
    %79 = arith.cmpi eq, %47, %78 : vector<1x128xi32>
    %c3_i32_31 = arith.constant 3 : i32
    %80 = vector.broadcast %c3_i32_31 : i32 to vector<1x128xi32>
    %81 = arith.cmpi eq, %47, %80 : vector<1x128xi32>
    %82 = arith.ori %79, %81 : vector<1x128xi1>
    %cst_32 = arith.constant 1.000000e+00 : f32
    %83 = vector.shape_cast %82 : vector<1x128xi1> to vector<1x128xi1>
    %84 = vector.broadcast %83 : vector<1x128xi1> to vector<64x128xi1>
    %85 = vector.shape_cast %71 : vector<64x1xf32> to vector<64x1xf32>
    %86 = vector.broadcast %85 : vector<64x1xf32> to vector<64x128xf32>
    %87 = vector.broadcast %cst_32 : f32 to vector<64x128xf32>
    %88 = arith.select %84, %86, %87 : vector<64x128xi1>, vector<64x128xf32>
    %89 = vector.shape_cast %77 : vector<1x128xi1> to vector<1x128xi1>
    %90 = vector.broadcast %89 : vector<1x128xi1> to vector<64x128xi1>
    %91 = vector.shape_cast %70 : vector<64x1xf32> to vector<64x1xf32>
    %92 = vector.broadcast %91 : vector<64x1xf32> to vector<64x128xf32>
    %93 = arith.select %90, %92, %88 : vector<64x128xi1>, vector<64x128xf32>
    %c0_i32_33 = arith.constant 0 : i32
    %94 = vector.broadcast %c0_i32_33 : i32 to vector<1x128xi32>
    %95 = arith.cmpi eq, %47, %94 : vector<1x128xi32>
    %c1_i32_34 = arith.constant 1 : i32
    %96 = vector.broadcast %c1_i32_34 : i32 to vector<1x128xi32>
    %97 = arith.cmpi eq, %47, %96 : vector<1x128xi32>
    %c4_i32 = arith.constant 4 : i32
    %98 = vector.broadcast %c4_i32 : i32 to vector<1x128xi32>
    %99 = arith.cmpi eq, %47, %98 : vector<1x128xi32>
    %cst_35 = arith.constant 0.000000e+00 : f32
    %100 = vector.shape_cast %99 : vector<1x128xi1> to vector<1x128xi1>
    %101 = vector.broadcast %100 : vector<1x128xi1> to vector<64x128xi1>
    %102 = vector.shape_cast %72 : vector<64x1xf32> to vector<64x1xf32>
    %103 = vector.broadcast %102 : vector<64x1xf32> to vector<64x128xf32>
    %104 = vector.broadcast %cst_35 : f32 to vector<64x128xf32>
    %105 = arith.select %101, %103, %104 : vector<64x128xi1>, vector<64x128xf32>
    %106 = vector.shape_cast %97 : vector<1x128xi1> to vector<1x128xi1>
    %107 = vector.broadcast %106 : vector<1x128xi1> to vector<64x128xi1>
    %108 = vector.shape_cast %69 : vector<64x1xf32> to vector<64x1xf32>
    %109 = vector.broadcast %108 : vector<64x1xf32> to vector<64x128xf32>
    %110 = arith.select %107, %109, %105 : vector<64x128xi1>, vector<64x128xf32>
    %111 = vector.shape_cast %95 : vector<1x128xi1> to vector<1x128xi1>
    %112 = vector.broadcast %111 : vector<1x128xi1> to vector<64x128xi1>
    %113 = vector.shape_cast %68 : vector<64x1xf32> to vector<64x1xf32>
    %114 = vector.broadcast %113 : vector<64x1xf32> to vector<64x128xf32>
    %115 = arith.select %112, %114, %110 : vector<64x128xi1>, vector<64x128xf32>
    %116 = arith.mulf %93, %21 : vector<64x128xf32>
    %117 = arith.addf %116, %115 : vector<64x128xf32>
    %cst_36 = arith.constant 4.13516665 : f32
    %118 = vector.broadcast %cst_36 : f32 to vector<64x128xf32>
    %119 = arith.minimumf %21, %118 : vector<64x128xf32>
    %120 = math.exp %119 : vector<64x128xf32>
    %121 = arith.mulf %93, %120 : vector<64x128xf32>
    %122 = vector.shape_cast %53 : vector<1x128xi1> to vector<1x128xi1>
    %123 = vector.broadcast %122 : vector<1x128xi1> to vector<64x128xi1>
    %124 = arith.select %123, %121, %117 : vector<64x128xi1>, vector<64x128xf32>
    %cst_37 = arith.constant 0.000000e+00 : f32
    %125 = vector.shape_cast %29 : vector<1x128xi1> to vector<1x128xi1>
    %126 = vector.broadcast %125 : vector<1x128xi1> to vector<64x128xi1>
    %127 = vector.broadcast %cst_37 : f32 to vector<64x128xf32>
    %128 = arith.select %126, %124, %127 : vector<64x128xi1>, vector<64x128xf32>
    %129 = vector.shape_cast %24 : vector<1x128xi1> to vector<1x128xi1>
    %130 = vector.broadcast %129 : vector<1x128xi1> to vector<64x128xi1>
    %131 = arith.select %130, %66, %128 : vector<64x128xi1>, vector<64x128xf32>
    %c0_38 = arith.constant 0 : index
    %c0_39 = arith.constant 0 : index
    %132 = vector.load %arg9[%c0_38, %c0_39] : memref<64x128xf32, #tpu.memory_space<vmem>>, vector<64x128xf32>
    tpu.vector_store %arg9[%c0_38, %c0_39], %131 {strides = array<i32>} : memref<64x128xf32, #tpu.memory_space<vmem>>, vector<64x128xf32>,
    return
  }
  func.func @transform_0(%arg0: i32) -> (i32, i32) {
    %c0_i32 = arith.constant 0 : i32
    %c0_i32_0 = arith.constant 0 : i32
    return %arg0, %c0_i32 : i32, i32
  }
  func.func @transform_1(%arg0: i32) -> (i32, i32) {
    %c0_i32 = arith.constant 0 : i32
    %c0_i32_0 = arith.constant 0 : i32
    return %arg0, %c0_i32 : i32, i32
  }
  func.func @transform_2(%arg0: i32) -> (i32, i32) {
    %c0_i32 = arith.constant 0 : i32
    %c0_i32_0 = arith.constant 0 : i32
    %c0_i32_1 = arith.constant 0 : i32
    return %c0_i32, %c0_i32_0 : i32, i32
  }
  func.func @transform_3(%arg0: i32) -> (i32, i32) {
    %c0_i32 = arith.constant 0 : i32
    %c0_i32_0 = arith.constant 0 : i32
    %c0_i32_1 = arith.constant 0 : i32
    return %c0_i32, %c0_i32_0 : i32, i32
  }
  func.func @transform_4(%arg0: i32) -> (i32, i32) {
    %c0_i32 = arith.constant 0 : i32
    %c0_i32_0 = arith.constant 0 : i32
    %c0_i32_1 = arith.constant 0 : i32
    return %c0_i32, %c0_i32_0 : i32, i32
  }
  func.func @transform_5(%arg0: i32) -> (i32, i32) {
    %c0_i32 = arith.constant 0 : i32
    %c0_i32_0 = arith.constant 0 : i32
    %c0_i32_1 = arith.constant 0 : i32
    return %c0_i32, %c0_i32_0 : i32, i32
  }
  func.func @transform_6(%arg0: i32) -> (i32, i32) {
    %c0_i32 = arith.constant 0 : i32
    %c0_i32_0 = arith.constant 0 : i32
    %c0_i32_1 = arith.constant 0 : i32
    return %c0_i32, %c0_i32_0 : i32, i32
  }
  func.func @transform_7(%arg0: i32) -> (i32, i32) {
    %c0_i32 = arith.constant 0 : i32
    %c0_i32_0 = arith.constant 0 : i32
    %c0_i32_1 = arith.constant 0 : i32
    return %c0_i32, %c0_i32_0 : i32, i32
  }
  func.func @transform_8(%arg0: i32) -> (i32, i32) {
    %c0_i32 = arith.constant 0 : i32
    %c0_i32_0 = arith.constant 0 : i32
    return %arg0, %c0_i32 : i32, i32
  }
}

</mosaic_0001>

<bundles_post_ra>
// kernel: _forward_core.1
= control target key start
LH: loop header
LB: loop body
LE: loop exit
PB: predicated region body
PF: predicated region fallthrough
CT: control target
= control target key end

     0   :  { %s1617_s27 = smov 0   ;;  %s2152_s0 = inlined_call_operand.vmem [shape: bf16[128,128], index: 0, kind: input, shape index: {}]   ;;  %s2153_s1 = inlined_call_operand.vmem [shape: f32[128,8], index: 1, kind: input, shape index: {}]   ;;  %s2154_s2 = inlined_call_operand.vmem [shape: bf16[128,128], index: 2, kind: input, shape index: {}]   ;;  %s2155_s3 = inlined_call_operand.vmem [shape: f32[1,128], index: 3, kind: input, shape index: {}]   ;;  %s2156_s4 = inlined_call_operand.vmem [shape: bf16[128,128], index: 4, kind: input, shape index: {}]   ;;  %s2157_s5 = inlined_call_operand.vmem [shape: f32[1,128], index: 5, kind: input, shape index: {}]   ;;  %s2158_s6 = inlined_call_operand.vmem [shape: bf16[128,128], index: 6, kind: input, shape index: {}]   ;;  %s2159_s7 = inlined_call_operand.vmem [shape: f32[1,128], index: 7, kind: input, shape index: {}]   ;;  %s2160_s8 = inlined_call_operand.vmem [shape: f32[128,128], index: 8, kind: output, shape index: {}]  }
   0x1 LB: > { %s1288_s28 = sadd.s32 4294967295, %s1565_s27   ;;  %p1292_p0 = scmp.ge.s32.totalorder %s1565_s27, 1  ;;  %s1565_s27 = sphi %s1617_s27, %s18_s27  }
   0x2   : > { %p274_p1 = scmp.lt.s32.totalorder %s1565_s27, 3 }
   0x4   : > { %p275_p2 = pnand %p1292_p0, %p274_p1 }
   0x5   : > { %v1483_v0 = vld [vmem:[%s2154_s2] sm:$0xff] (!%p275_p2)   ;;  %s1293_s9 = sshll.u32 (!%p275_p2), %s1288_s28, 3  ;;  %v1484_v1 = vld [vmem:[%s2154_s2 + $0x8] sm:$0xff] (!%p275_p2)   ;;  %v1485_v2 = vld [vmem:[%s2154_s2 + $0x10] sm:$0xff] (!%p275_p2)   ;;  %v1567_v57 = vmov (!%p275_p2), 3   ;;  %v1568_v62 = vmov (!%p275_p2), 2  }
   0x6   : > { %278 = sbr.rel (%p275_p2) target bundleno = 1072 (0x430), region = 52  ;;  %p314_p3 = scmp.lt.s32.totalorder (!%p275_p2), %s1293_s9, 15  ;;  %1370 = vmatprep.subr.bf16.mxu0 (!%p275_p2), %v1483_v0  ;;  %v1486_v3 = vld [vmem:[%s2154_s2 + $0x18] sm:$0xff] (!%p275_p2)   ;;  %v1487_v5 = vld [vmem:[%s2154_s2 + $0x20] sm:$0xff] (!%p275_p2)   ;;  %v1496_v7 = vld [vmem:[%s2156_s4 + $0x8] sm:$0xff] (!%p275_p2)   ;;  %1474 = vset.pattern.permute.xlu1 (!%p275_p2), %v1567_v57 }
   0x7   : > { %1371 = vmatpush3.bf16.msra.mxu0 (!%p275_p2), %v1483_v0  ;;  %v1495_v6 = vld [vmem:[%s2156_s4] sm:$0xff] (!%p275_p2)   ;;  %v1488_v8 = vld [vmem:[%s2154_s2 + $0x28] sm:$0xff] (!%p275_p2)   ;;  %v1497_v9 = vld [vmem:[%s2156_s4 + $0x10] sm:$0xff] (!%p275_p2)   ;;  %1473 = vset.pattern.permute.xlu0 (!%p275_p2), %v1567_v57 }
   0x8   : > { %1372 = vmatprep.subr.bf16.mxu0 (!%p275_p2), %v1484_v1  ;;  %1394 = vmatprep.subr.bf16.mxu1 (!%p275_p2), %v1495_v6  ;;  %v1489_v10 = vld [vmem:[%s2154_s2 + $0x30] sm:$0xff] (!%p275_p2)   ;;  %v1498_v11 = vld [vmem:[%s2156_s4 + $0x18] sm:$0xff] (!%p275_p2)   ;;  %v1499_v13 = vld [vmem:[%s2156_s4 + $0x20] sm:$0xff] (!%p275_p2)  }
   0x9   : > { %1395 = vmatpush3.bf16.msra.mxu1 (!%p275_p2), %v1495_v6  ;;  %v1490_v12 = vld [vmem:[%s2154_s2 + $0x38] sm:$0xff] (!%p275_p2)   ;;  %v1500_v14 = vld [vmem:[%s2156_s4 + $0x28] sm:$0xff] (!%p275_p2)   ;;  %v1501_v18 = vld [vmem:[%s2156_s4 + $0x30] sm:$0xff] (!%p275_p2)  }
   0xa   : > { %1396 = vmatprep.subr.bf16.mxu1 (!%p275_p2), %v1496_v7  ;;  %v1502_v19 = vld [vmem:[%s2156_s4 + $0x38] sm:$0xff] (!%p275_p2)   ;;  %v1503_v20 = vld [vmem:[%s2158_s6] sm:$0xff] (!%p275_p2)   ;;  %v1504_v21 = vld [vmem:[%s2158_s6 + $0x8] sm:$0xff] (!%p275_p2)  }
   0xb   : > { %1373 = vmatpush3.bf16.msra.mxu0 (!%p275_p2), %v1484_v1  ;;  %v1505_v22 = vld [vmem:[%s2158_s6 + $0x10] sm:$0xff] (!%p275_p2)   ;;  %v1506_v23 = vld [vmem:[%s2158_s6 + $0x18] sm:$0xff] (!%p275_p2)   ;;  %v1507_v24 = vld [vmem:[%s2158_s6 + $0x20] sm:$0xff] (!%p275_p2)  }
   0xc   : > { %1374 = vmatprep.subr.bf16.mxu0 (!%p275_p2), %v1485_v2  ;;  %v1508_v25 = vld [vmem:[%s2158_s6 + $0x28] sm:$0xff] (!%p275_p2)   ;;  %v1299_v26 = vld [vmem:[%s2155_s3] ss:$0 sm:$0xff] (!%p275_p2)  ;;  %v1509_v55 = vld [vmem:[%s2158_s6 + $0x30] sm:$0xff] (!%p275_p2)  }
   0xd   : > { %s2170_s9 = smov (!%p314_p3, %s1293_s9), 15  ;;  %1397 = vmatpush3.bf16.msra.mxu1 %v1496_v7  ;;  %v1510_v56 = vld [vmem:[%s2158_s6 + $0x38] sm:$0xff]  }
   0xe   : > { %s1294_s14 = sshll.u32 %s2170_s9, 2  ;;  %1398 = vmatprep.subr.bf16.mxu1 %v1497_v9  ;;  %s1296_s23 = sshll.u32 %s2170_s9, 3 }
   0xf   : > { %s1640_s17 = scalar_lea.vmem %s2152_s0, %s1294_s14  ;;  %1375 = vmatpush3.bf16.msra.mxu0 %v1485_v2  ;;  %s323_s26 = scalar_lea.vmem %s2153_s1, %s1296_s23  ;;  %v1569_v2 = vmov 4  }
  0x10   : > { %v1491_v4 = vld [vmem:[%s1640_s17] sm:$0xff]   ;;  %1376 = vmatprep.subr.bf16.mxu0 %v1486_v3  ;;  %v1492_v15 = vld [vmem:[%s1640_s17 + $0x8] sm:$0xff]   ;;  %v1493_v16 = vld [vmem:[%s1640_s17 + $0x10] sm:$0xff]   ;;  %s2097_s12 = scalar_lea.vmem %s2160_s8, %s1296_s23 }
  0x11   : > { %1386 = vmatprep.mubr.bf16.mxu0 %v1491_v4  ;;  %1399 = vmatpush3.bf16.msra.mxu1 %v1497_v9  ;;  %v1494_v17 = vld [vmem:[%s1640_s17 + $0x18] sm:$0xff]   ;;  %v1718_v58 = vld [vmem:[%s323_s26 + $0x8] sm:$0xff]  ;;  %v1721_v59 = vld [vmem:[%s323_s26 + $0x10] sm:$0xff]  ;;  %v1570_v4 = vmov 1  }
  0x12   : > { %1400 = vmatprep.subr.bf16.mxu1 %v1498_v11  ;;  %926 = vperm.xlu1 %1474, %v1718_v58   ;;  %v1723_v60 = vld [vmem:[%s323_s26] sm:$0xff]  ;;  %v1727_v61 = vld [vmem:[%s323_s26 + $0x18] sm:$0xff]  ;;  %v1735_v0 = vld [vmem:[%s323_s26 + $0x28] sm:$0xff] }
  0x13   : > { %1377 = vmatpush3.bf16.msra.mxu0 %v1486_v3  ;;  %921 = vperm.xlu0 %1473, %v1723_v60   ;;  %v1731_v63 = vld [vmem:[%s323_s26 + $0x20] sm:$0xff]  ;;  %v1737_v1 = vld [vmem:[%s323_s26 + $0x30] sm:$0xff]  ;;  %v1743_v3 = vld [vmem:[%s323_s26 + $0x38] sm:$0xff] }
  0x14   : > { %1378 = vmatprep.subr.bf16.mxu0 %v1487_v5 }
  0x15   : > { %1401 = vmatpush3.bf16.msra.mxu1 %v1498_v11 }
  0x16   : > { %1402 = vmatprep.subr.bf16.mxu1 %v1499_v13  ;;  %931 = vperm.xlu1 %1474, %v1721_v59  }
  0x17   : > { %1379 = vmatpush3.bf16.msra.mxu0 %v1487_v5  ;;  %1476 = vset.pattern.permute.xlu0 %v1568_v62  ;;  %v796_v5 = vlaneseq }
  0x18   : > { %1380 = vmatprep.subr.bf16.mxu0 %v1488_v8  ;;  %974 = vperm.xlu0 %1476, %v1718_v58  }
  0x19   : > { %1403 = vmatpush3.bf16.msra.mxu1 %v1499_v13  ;;  %v1763_v6 = vand.u32 127, %v796_v5 }
  0x1a   : > { %1404 = vmatprep.subr.bf16.mxu1 %v1500_v14  ;;  %936 = vperm.xlu1 %1474, %v1727_v61  }
  0x1b   : > { %1381 = vmatpush3.bf16.msra.mxu0 %v1488_v8  ;;  %v1330_v7 = vadd.s32 4294967291, %v1763_v6  ;;  %vm798_vm11 = vcmp.lt.s32.totalorder %v1763_v6, 5  ;;  %vm799_vm12 = vcmp.ge.s32.totalorder %v1763_v6, 5  ;;  %vm800_vm13 = vcmp.lt.s32.totalorder %v1763_v6, 30 }
  0x1c   : > { %1382 = vmatprep.subr.bf16.mxu0 %v1489_v10  ;;  %986 = vperm.xlu0 %1476, %v1731_v63   ;;  %vm1995_vm14 = vmand %vm799_vm12, %vm800_vm13 }
  0x1d   : > { %1405 = vmatpush3.bf16.msra.mxu1 %v1500_v14  ;;  %v804_v8 = vsub.s32 0, %v1330_v7  ;;  %vm803_vm0 = vcmp.lt.s32.totalorder %v1330_v7, 0 }
  0x1e   : > { %1406 = vmatprep.subr.bf16.mxu1 %v1501_v18  ;;  %941 = vperm.xlu1 %1474, %v1731_v63  }
  0x1f   : > { %1383 = vmatpush3.bf16.msra.mxu0 %v1489_v10  ;;  %v1331_v9 = vmin.u32 %v1330_v7, %v804_v8 }
  0x20   : > { %1384 = vmatprep.subr.bf16.mxu0 %v1490_v12  ;;  %994 = vperm.xlu0 %1476, %v1737_v1  }
  0x21   : > { %1407 = vmatpush3.bf16.msra.mxu1 %v1501_v18  ;;  %v1769_v10 = vmul.u32.u64.low 3435973837, %v1331_v9  ;;  %v1770_v11 = vmul.u32.u64.high 3435973837, %v1331_v9, %v1769_v10 }
  0x22   : > { %1408 = vmatprep.subr.bf16.mxu1 %v1502_v19  ;;  %946 = vperm.xlu1 %1474, %v1735_v0  }
  0x23   : > { %1385 = vmatpush3.bf16.msra.mxu0 %v1490_v12  ;;  %v809_v12 = vshrl.u32 %v1770_v11, 2 }
  0x24   : > { %1418 = vmatprep.subr.bf16.mxu0 %v1503_v20  ;;  %1477 = vset.pattern.permute.xlu0 %v1569_v2 }
  0x25   : > { %1409 = vmatpush3.bf16.msra.mxu1 %v1502_v19  ;;  %1013 = vperm.xlu0 %1477, %v1723_v60   ;;  %v810_v13 = vmul.u32 5, %v809_v12 }
  0x26   : > { %1387 = vmatmul.mubr.bf16.vlgmr.msra.gmra.mrb[0].mxu0 %v1492_v15  ;;  %1442 = vmatprep.subr.bf16.mxu1 %v1503_v20  ;;  %v1312_v15 = vld [vmem:[%s2157_s5] ss:$0 sm:$0xff] }
  0x27   : > { %1390 = vmatprep.mubr.bf16.mxu0 %v1493_v16  ;;  %1419 = vmatpush3.bf16.msra.mxu0 %v1503_v20  ;;  %v811_v14 = vsub.s32 %v1331_v9, %v810_v13 }
  0x28   : > { %1420 = vmatprep.subr.bf16.mxu0 %v1504_v21  ;;  %951 = vperm.xlu1 %1474, %v1737_v1  }
  0x29   : > { %1025 = vperm.xlu0 %1477, %v1727_v61   ;;  %v812_v19 = vsub.s32 0, %v811_v14 }
  0x2b   : > { %1421 = vmatpush3.bf16.msra.mxu0 %v1504_v21 }
  0x2c   : > { %1422 = vmatprep.subr.bf16.mxu0 %v1505_v22  ;;  %956 = vperm.xlu1 %1474, %v1743_v3  }
  0x2d   : > { %1033 = vperm.xlu0 %1477, %v1735_v0  }
  0x2e   : > { %1391 = vmatmul.mubr.bf16.gmra.mrb[4].mxu0 %v1494_v17 }
  0x2f   : > { %1423 = vmatpush3.bf16.msra.mxu0 %v1505_v22 }
  0x30   : > { %1424 = vmatprep.subr.bf16.mxu0 %v1506_v23  ;;  %1475 = vset.pattern.permute.xlu1 %v1568_v62 }
  0x31   : > { %970 = vperm.xlu1 %1475, %v1723_v60   ;;  %1041 = vperm.xlu0 %1477, %v1743_v3  }
  0x33   : > { %1425 = vmatpush3.bf16.msra.mxu0 %v1506_v23 }
  0x34   : > { %1426 = vmatprep.subr.bf16.mxu0 %v1507_v24 }
  0x35   : > { %978 = vperm.xlu1 %1475, %v1721_v59   ;;  %1480 = vset.pattern.permute.xlu0 %v1570_v4 }
  0x36   : > { %1059 = vperm.xlu0 %1480, %v1718_v58  }
  0x37   : > { %1427 = vmatpush3.bf16.msra.mxu0 %v1507_v24 }
  0x38   : > { %1428 = vmatprep.subr.bf16.mxu0 %v1508_v25 }
  0x39   : > { %982 = vperm.xlu1 %1475, %v1727_v61  }
  0x3a   : > { %1071 = vperm.xlu0 %1480, %v1731_v63  }
  0x3b   : > { %1429 = vmatpush3.bf16.msra.mxu0 %v1508_v25 }
  0x3c   : > { %1430 = vmatprep.subr.bf16.mxu0 %v1509_v55 }
  0x3d   : > { %990 = vperm.xlu1 %1475, %v1735_v0  }
  0x3e   : > { %1079 = vperm.xlu0 %1480, %v1737_v1  }
  0x3f   : > { %1431 = vmatpush3.bf16.msra.mxu0 %v1509_v55 }
  0x40   : > { %1432 = vmatprep.subr.bf16.mxu0 %v1510_v56 }
  0x41   : > { %998 = vperm.xlu1 %1475, %v1743_v3  }
  0x43   : > { %1433 = vmatpush3.bf16.msra.mxu0 %v1510_v56 }
  0x45   : > { %1478 = vset.pattern.permute.xlu1 %v1569_v2 }
  0x46   : > { %1017 = vperm.xlu1 %1478, %v1718_v58  }
  0x4a   : > { %1021 = vperm.xlu1 %1478, %v1721_v59  }
  0x4e   : > { %1029 = vperm.xlu1 %1478, %v1731_v63  }
  0x52   : > { %1037 = vperm.xlu1 %1478, %v1737_v1  }
  0x56   : > { %1479 = vset.pattern.permute.xlu1 %v1570_v4 }
  0x57   : > { %1055 = vperm.xlu1 %1479, %v1723_v60  }
  0x5b   : > { %1063 = vperm.xlu1 %1479, %v1721_v59  }
  0x5f   : > { %1067 = vperm.xlu1 %1479, %v1727_v61  }
  0x63   : > { %1075 = vperm.xlu1 %1479, %v1735_v0  }
  0x67   : > { %1083 = vperm.xlu1 %1479, %v1743_v3  }
  0x92   : > { %v922_v7 = vpop.permute.xlu0 %921 }
  0xf9   : > { %v1388_v27 = vpop.f32.mrb[0].mxu0 }
  0xfa   : > { %v478_v28 = vadd.f32 %v1388_v27, %v1299_v26  ;;  %v469_v29 = vpop.f32.mrb[1].mxu0  ;;  %v813_v27 = vsel %vm803_vm0, %v812_v19, %v811_v14 }
  0xfb   : > { %v470_v30 = vadd.f32 %v1299_v26, %v469_v29  ;;  %v1389_v31 = vpop.f32.mrb[2].mxu0  ;;  %vm814_vm1 = vcmp.ne.s32.totalorder %v813_v27, 0  ;;  %vm815_vm2 = vcmp.lt.s32.totalorder %v813_v27, 0 }
  0xfc   : > { %v481_v32 = vadd.f32 %v1389_v31, %v1299_v26  ;;  %v472_v33 = vpop.f32.mrb[3].mxu0  ;;  %v502_v35 = vmax.f32 %v478_v28, 0.0  ;;  %vm816_vm3 = vmand %vm815_vm2, %vm814_vm1 }
  0xfd   : > { %v473_v34 = vadd.f32 %v1299_v26, %v472_v33  ;;  %v500_v37 = vmax.f32 %v470_v30, 0.0 }
  0xfe   : > { %v503_v36 = vmax.f32 %v481_v32, 0.0 }
  0xff   : > { %v501_v38 = vmax.f32 %v473_v34, 0.0 }
 0x100   : > { %v509_v39 = vpack.c.bf16 %v503_v36, %v502_v35 }
 0x101   : > { %v1392_v40 = vpop.f32.mrb[4].mxu0  ;;  %v508_v41 = vpack.c.bf16 %v501_v38, %v500_v37  ;;  %v817_v37 = vadd.s32 5, %v813_v27 }
 0x102   : > { %v494_v42 = vadd.f32 %v1392_v40, %v1299_v26  ;;  %v485_v43 = vpop.f32.mrb[5].mxu0 }
 0x103   : > { %v486_v44 = vadd.f32 %v1299_v26, %v485_v43  ;;  %v1393_v45 = vpop.f32.mrb[6].mxu0  ;;  %1410 = vmatprep.mubr.bf16.mxu1 %v508_v41 }
 0x104   : > { %v506_v46 = vmax.f32 %v494_v42, 0.0  ;;  %v497_v47 = vadd.f32 %v1393_v45, %v1299_v26  ;;  %v488_v48 = vpop.f32.mrb[7].mxu0  ;;  %1411 = vmatmul.mubr.bf16.vlgmr.msra.gmra.mrb[0].mxu1 %v509_v39  ;;  %v1776_v45 = vsel %vm816_vm3, %v817_v37, %v813_v27  ;;  %v1571_v27 = vmov 0  }
 0x105   : > { %v504_v49 = vmax.f32 %v486_v44, 0.0  ;;  %v489_v50 = vadd.f32 %v1299_v26, %v488_v48  ;;  %1450 = vmatpush3.bf16.msra.mxu1 %v1503_v20  ;;  %vm820_vm4 = vcmp.eq.s32.totalorder %v1776_v45, 3  ;;  %vm915_vm5 = vcmp.eq.s32.totalorder %v1776_v45, 1  ;;  %1482 = vset.pattern.permute.xlu1 %v1571_v27 }
 0x106   : > { %v507_v51 = vmax.f32 %v497_v47, 0.0  ;;  %1443 = vmatprep.subr.bf16.mxu1 %v1504_v21  ;;  %vm1784_vm6 = vmor %vm915_vm5, %vm820_vm4  ;;  %vm819_vm7 = vcmp.eq.s32.totalorder %v1776_v45, 2  ;;  %vm913_vm8 = vcmp.eq.s32.totalorder %v1776_v45, 0  ;;  %1481 = vset.pattern.permute.xlu0 %v1571_v27  ;;  %vm1009_vm10 = vcmp.eq.s32.totalorder %v1776_v45, 4 }
 0x107   : > { %v505_v52 = vmax.f32 %v489_v50, 0.0  ;;  %vm1808_vm9 = vmor %vm913_vm8, %vm819_vm7  ;;  %v959_v10 = vsel %vm1784_vm6, %v922_v7, 1.0 }
 0x108   : > { %v511_v53 = vpack.c.bf16 %v507_v51, %v506_v46  ;;  %vm821_vm15 = vmor %vm819_vm7, %vm820_vm4 }
 0x109   : > { %v510_v54 = vpack.c.bf16 %v505_v52, %v504_v49  ;;  %1451 = vmatpush3.bf16.msra.mxu1 %v1504_v21  ;;  %v927_v49 = vpop.permute.xlu1 %926  ;;  %vm2007_vm0 = vmand %vm1995_vm14, %vm821_vm15 }
 0x10a   : > { %1444 = vmatprep.subr.bf16.mxu1 %v1505_v22  ;;  %v960_v50 = vsel %vm1784_vm6, %v927_v49, 1.0 }
 0x10b   : > { %1414 = vmatprep.mubr.bf16.mxu1 %v510_v54 }
 0x10c   : > { %1415 = vmatmul.mubr.bf16.gmra.mrb[4].mxu1 %v511_v53 }
 0x10d   : > { %1452 = vmatpush3.bf16.msra.mxu1 %v1505_v22  ;;  %v932_v51 = vpop.permute.xlu1 %931 }
 0x10e   : > { %1445 = vmatprep.subr.bf16.mxu1 %v1506_v23  ;;  %v961_v52 = vsel %vm1784_vm6, %v932_v51, 1.0 }
 0x111   : > { %1453 = vmatpush3.bf16.msra.mxu1 %v1506_v23  ;;  %v937_v53 = vpop.permute.xlu1 %936 }
 0x112   : > { %1446 = vmatprep.subr.bf16.mxu1 %v1507_v24  ;;  %v962_v54 = vsel %vm1784_vm6, %v937_v53, 1.0 }
 0x115   : > { %1454 = vmatpush3.bf16.msra.mxu1 %v1507_v24 }
 0x116   : > { %1447 = vmatprep.subr.bf16.mxu1 %v1508_v25 }
 0x119   : > { %1455 = vmatpush3.bf16.msra.mxu1 %v1508_v25 }
 0x11a   : > { %1448 = vmatprep.subr.bf16.mxu1 %v1509_v55 }
 0x11d   : > { %1456 = vmatpush3.bf16.msra.mxu1 %v1509_v55  ;;  %v942_v55 = vpop.permute.xlu1 %941 }
 0x11e   : > { %1449 = vmatprep.subr.bf16.mxu1 %v1510_v56 }
 0x121   : > { %1457 = vmatpush3.bf16.msra.mxu1 %v1510_v56  ;;  %v963_v56 = vsel %vm1784_vm6, %v942_v55, 1.0  ;;  %v947_v57 = vpop.permute.xlu1 %946 }
 0x122   : > { %v964_v62 = vsel %vm1784_vm6, %v947_v57, 1.0 }
 0x125   : > { %v952_v2 = vpop.permute.xlu1 %951 }
 0x126   : > { %v965_v4 = vsel %vm1784_vm6, %v952_v2, 1.0 }
 0x129   : > { %v957_v5 = vpop.permute.xlu1 %956 }
 0x12a   : > { %v966_v8 = vsel %vm1784_vm6, %v957_v5, 1.0  ;;  %v1321_v5 = vld [vmem:[%s2159_s7] ss:$0 sm:$0xff] }
 0x12d   : > { %v971_v11 = vpop.permute.xlu1 %970 }
 0x12e   : > { %v1816_v12 = vsel %vm1808_vm9, %v971_v11, %v959_v10 }
 0x131   : > { %v979_v13 = vpop.permute.xlu1 %978 }
 0x132   : > { %v1820_v14 = vsel %vm1808_vm9, %v979_v13, %v961_v52 }
 0x1d7   : > { %v1412_v16 = vpop.f32.mrb[0].mxu1 }
 0x1d8   : > { %v626_v17 = vadd.f32 %v1412_v16, %v1312_v15  ;;  %v617_v18 = vpop.f32.mrb[1].mxu1 }
 0x1d9   : > { %v618_v20 = vadd.f32 %v1312_v15, %v617_v18  ;;  %v1413_v21 = vpop.f32.mrb[2].mxu1 }
 0x1da   : > { %v629_v22 = vadd.f32 %v1413_v21, %v1312_v15  ;;  %v620_v23 = vpop.f32.mrb[3].mxu1  ;;  %v650_v25 = vmax.f32 %v626_v17, 0.0  ;;  %v975_v17 = vpop.permute.xlu0 %974 }
 0x1db   : > { %v621_v24 = vadd.f32 %v1312_v15, %v620_v23  ;;  %v648_v28 = vmax.f32 %v618_v20, 0.0  ;;  %v1828_v18 = vsel %vm1808_vm9, %v975_v17, %v960_v50 }
 0x1dc   : > { %v651_v26 = vmax.f32 %v629_v22, 0.0 }
 0x1dd   : > { %v649_v29 = vmax.f32 %v621_v24, 0.0 }
 0x1de   : > { %v657_v30 = vpack.c.bf16 %v651_v26, %v650_v25  ;;  %v987_v20 = vpop.permute.xlu0 %986 }
 0x1df   : > { %v656_v31 = vpack.c.bf16 %v649_v29, %v648_v28  ;;  %v1416_v32 = vpop.f32.mrb[4].mxu1  ;;  %v1836_v24 = vsel %vm1808_vm9, %v987_v20, %v963_v56 }
 0x1e0   : > { %v642_v33 = vadd.f32 %v1416_v32, %v1312_v15  ;;  %v633_v34 = vpop.f32.mrb[5].mxu1 }
 0x1e1   : > { %v634_v35 = vadd.f32 %v1312_v15, %v633_v34  ;;  %v1417_v36 = vpop.f32.mrb[6].mxu1  ;;  %1434 = vmatprep.mubr.bf16.mxu0 %v656_v31 }
 0x1e2   : > { %v654_v38 = vmax.f32 %v642_v33, 0.0  ;;  %v645_v39 = vadd.f32 %v1417_v36, %v1312_v15  ;;  %v636_v40 = vpop.f32.mrb[7].mxu1  ;;  %1435 = vmatmul.mubr.bf16.vlgmr.msra.gmra.mrb[8].mxu0 %v657_v30  ;;  %v995_v22 = vpop.permute.xlu0 %994 }
 0x1e3   : > { %v652_v41 = vmax.f32 %v634_v35, 0.0  ;;  %v637_v42 = vadd.f32 %v1312_v15, %v636_v40  ;;  %v983_v15 = vpop.permute.xlu1 %982  ;;  %v1844_v26 = vsel %vm1808_vm9, %v995_v22, %v965_v4 }
 0x1e4   : > { %v655_v43 = vmax.f32 %v645_v39, 0.0  ;;  %v1824_v16 = vsel %vm1808_vm9, %v983_v15, %v962_v54 }
 0x1e5   : > { %v653_v44 = vmax.f32 %v637_v42, 0.0 }
 0x1e6   : > { %v659_v46 = vpack.c.bf16 %v655_v43, %v654_v38  ;;  %v1014_v28 = vpop.permute.xlu0 %1013 }
 0x1e7   : > { %v658_v47 = vpack.c.bf16 %v653_v44, %v652_v41  ;;  %v991_v19 = vpop.permute.xlu1 %990  ;;  %v1044_v29 = vsel %vm1009_vm10, %v1014_v28, 0.0 }
 0x1e8   : > { %v1832_v23 = vsel %vm1808_vm9, %v991_v19, %v964_v62 }
 0x1e9   : > { %1438 = vmatprep.mubr.bf16.mxu1 %v658_v47 }
 0x1ea   : > { %1439 = vmatmul.mubr.bf16.vlgmr.msra.gmra.mrb[8].mxu1 %v659_v46  ;;  %v1026_v31 = vpop.permute.xlu0 %1025 }
 0x1eb   : > { %v999_v21 = vpop.permute.xlu1 %998  ;;  %v1047_v33 = vsel %vm1009_vm10, %v1026_v31, 0.0 }
 0x1ec   : > { %v1840_v25 = vsel %vm1808_vm9, %v999_v21, %v966_v8 }
 0x1ee   : > { %v1034_v35 = vpop.permute.xlu0 %1033 }
 0x1ef   : > { %v1018_v30 = vpop.permute.xlu1 %1017  ;;  %v1049_v37 = vsel %vm1009_vm10, %v1034_v35, 0.0 }
 0x1f0   : > { %v1045_v32 = vsel %vm1009_vm10, %v1018_v30, 0.0 }
 0x1f2   : > { %v1042_v39 = vpop.permute.xlu0 %1041 }
 0x1f3   : > { %v1022_v34 = vpop.permute.xlu1 %1021  ;;  %v1051_v41 = vsel %vm1009_vm10, %v1042_v39, 0.0 }
 0x1f4   : > { %v1046_v36 = vsel %vm1009_vm10, %v1022_v34, 0.0 }
 0x1f6   : > { %v1060_v43 = vpop.permute.xlu0 %1059 }
 0x1f7   : > { %v1030_v38 = vpop.permute.xlu1 %1029  ;;  %v1865_v46 = vsel %vm915_vm5, %v1060_v43, %v1045_v32 }
 0x1f8   : > { %v1048_v40 = vsel %vm1009_vm10, %v1030_v38, 0.0 }
 0x1fa   : > { %v1072_v48 = vpop.permute.xlu0 %1071 }
 0x1fb   : > { %v1038_v42 = vpop.permute.xlu1 %1037  ;;  %v1873_v50 = vsel %vm915_vm5, %v1072_v48, %v1048_v40 }
 0x1fc   : > { %v1050_v44 = vsel %vm1009_vm10, %v1038_v42, 0.0 }
 0x1fe   : > { %v1080_v52 = vpop.permute.xlu0 %1079 }
 0x1ff   : > { %v1056_v47 = vpop.permute.xlu1 %1055  ;;  %v1881_v54 = vsel %vm915_vm5, %v1080_v52, %v1050_v44 }
 0x200   : > { %v1869_v49 = vsel %vm915_vm5, %v1056_v47, %v1044_v29 }
 0x203   : > { %v1064_v51 = vpop.permute.xlu1 %1063 }
 0x204   : > { %v1877_v53 = vsel %vm915_vm5, %v1064_v51, %v1046_v36 }
 0x207   : > { %v1068_v55 = vpop.permute.xlu1 %1067 }
 0x208   : > { %v1885_v56 = vsel %vm915_vm5, %v1068_v55, %v1047_v33 }
 0x20b   : > { %v1076_v57 = vpop.permute.xlu1 %1075 }
 0x20c   : > { %v1889_v62 = vsel %vm915_vm5, %v1076_v57, %v1049_v37 }
 0x20f   : > { %v1084_v2 = vpop.permute.xlu1 %1083 }
 0x210   : > { %v1893_v4 = vsel %vm915_vm5, %v1084_v2, %v1051_v41 }
 0x2b5   : > { %v1436_v7 = vpop.f32.mrb[8].mxu0 }
 0x2b6   : > { %v774_v8 = vadd.f32 %v1436_v7, %v1321_v5  ;;  %v765_v9 = vpop.f32.mrb[9].mxu0 }
 0x2b7   : > { %v766_v10 = vadd.f32 %v1321_v5, %v765_v9  ;;  %v1437_v11 = vpop.f32.mrb[10].mxu0 }
 0x2b8   : > { %v1154_v13 = vmin.f32 %v774_v8, 4.1351666  ;;  %v777_v15 = vadd.f32 %v1437_v11, %v1321_v5  ;;  %v768_v17 = vpop.f32.mrb[11].mxu0  ;;  %v1901_v19 = vsel %vm798_vm11, %v774_v8, -1e+30  ;;  %v1904_v20 = vmul.f32 %v1820_v14, %v774_v8 }
 0x2b9   : > { %v1152_v21 = vmin.f32 %v766_v10, 4.1351666  ;;  %v769_v22 = vadd.f32 %v1321_v5, %v768_v17  ;;  %837 = vmax.xlane.f32.xlu1 %v1901_v19  ;;  %v1909_v27 = vsel %vm798_vm11, %v766_v10, -1e+30  ;;  %v1912_v28 = vmul.f32 %v1816_v12, %v766_v10 }
 0x2ba   : > { %v1164_v29 = vmul.f32 1.442695, %v1154_v13  ;;  %v1155_v30 = vmin.f32 %v777_v15, 4.1351666  ;;  %v1915_v31 = vmul.f32 %v1824_v16, %v777_v15  ;;  %833 = vmax.xlane.f32.xlu0 %v1909_v27  ;;  %v1923_v36 = vsel %vm798_vm11, %v777_v15, -1e+30 }
 0x2bb   : > { %v1160_v32 = vmul.f32 1.442695, %v1152_v21  ;;  %v1153_v33 = vmin.f32 %v769_v22, 4.1351666  ;;  %v1919_v34 = vmul.f32 %v1828_v18, %v769_v22  ;;  %v1928_v39 = vsel %vm798_vm11, %v769_v22, -1e+30 }
 0x2bc   : > { %1511 = vpow2.f32 %v1164_v29  ;;  %v1166_v35 = vmul.f32 1.442695, %v1155_v30 }
 0x2bd   : > { %1513 = vpow2.f32 %v1160_v32  ;;  %v1162_v37 = vmul.f32 1.442695, %v1153_v33  ;;  %v1440_v38 = vpop.f32.mrb[8].mxu1  ;;  %839 = vmax.xlane.f32.xlu1 %v1923_v36 }
 0x2be   : > { %1515 = vpow2.f32 %v1166_v35  ;;  %v790_v40 = vadd.f32 %v1440_v38, %v1321_v5  ;;  %v781_v41 = vpop.f32.mrb[9].mxu1  ;;  %835 = vmax.xlane.f32.xlu0 %v1928_v39 }
 0x2bf   : > { %1517 = vpow2.f32 %v1162_v37  ;;  %v782_v42 = vadd.f32 %v1321_v5, %v781_v41  ;;  %v1441_v43 = vpop.f32.mrb[10].mxu1 }
 0x2c0   : > { %v1158_v44 = vmin.f32 %v790_v40, 4.1351666  ;;  %v793_v47 = vadd.f32 %v1441_v43, %v1321_v5  ;;  %v784_v48 = vpop.f32.mrb[11].mxu1  ;;  %v1932_v51 = vmul.f32 %v1844_v26, %v790_v40  ;;  %v1936_v52 = vsel %vm798_vm11, %v790_v40, -1e+30 }
 0x2c1   : > { %v1156_v55 = vmin.f32 %v782_v42, 4.1351666  ;;  %v785_v57 = vadd.f32 %v1321_v5, %v784_v48  ;;  %v1939_v2 = vmul.f32 %v1836_v24, %v782_v42  ;;  %v1947_v13 = vsel %vm798_vm11, %v782_v42, -1e+30 }
 0x2c2   : > { %v1172_v7 = vmul.f32 1.442695, %v1158_v44  ;;  %v1159_v8 = vmin.f32 %v793_v47, 4.1351666  ;;  %v1942_v9 = vmul.f32 %v1840_v25, %v793_v47  ;;  %845 = vmax.xlane.f32.xlu0 %v1936_v52 }
 0x2c3   : > { %v1168_v10 = vmul.f32 1.442695, %v1156_v55  ;;  %v1157_v11 = vmin.f32 %v785_v57, 4.1351666  ;;  %v1950_v15 = vmul.f32 %v1832_v23, %v785_v57 }
 0x2c4   : > { %1519 = vpow2.f32 %v1172_v7  ;;  %v1174_v5 = vmul.f32 1.442695, %v1159_v8 }
 0x2c5   : > { %1521 = vpow2.f32 %v1168_v10  ;;  %v1170_v17 = vmul.f32 1.442695, %v1157_v11 }
 0x2c6   : > { %v1512_v21 = vpop.eup %1511  ;;  %1523 = vpow2.f32 %v1174_v5  ;;  %841 = vmax.xlane.f32.xlu0 %v1947_v13 }
 0x2c7   : > { %v1514_v22 = vpop.eup %1513  ;;  %1525 = vpow2.f32 %v1170_v17  ;;  %v1954_v29 = vmul.f32 %v1512_v21, %v1820_v14 }
 0x2c8   : > { %v1516_v30 = vpop.eup %1515  ;;  %v1957_v32 = vmul.f32 %v1514_v22, %v1816_v12 }
 0x2c9   : > { %v1518_v33 = vpop.eup %1517  ;;  %v1960_v35 = vmul.f32 %v1516_v30, %v1824_v16 }
 0x2ca   : > { %v1177_v37 = vmul.f32 %v1518_v33, %v1828_v18  ;;  %v1986_v18 = vsel %vm798_vm11, %v785_v57, -1e+30 }
 0x2ce   : > { %v1520_v38 = vpop.eup %1519  ;;  %1101 = vperm.xlu1 %1482, %v1718_v58   ;;  %v1981_v58 = vsel %vm798_vm11, %v793_v47, -1e+30 }
 0x2cf   : > { %v1522_v40 = vpop.eup %1521  ;;  %v1965_v41 = vmul.f32 %v1520_v38, %v1844_v26 }
 0x2d0   : > { %v1524_v42 = vpop.eup %1523  ;;  %v1968_v14 = vmul.f32 %v1522_v40, %v1836_v24 }
 0x2d1   : > { %v1526_v43 = vpop.eup %1525  ;;  %v1971_v12 = vmul.f32 %v1524_v42, %v1840_v25 }
 0x2d2   : > { %v1974_v16 = vmul.f32 %v1526_v43, %v1832_v23 }
 0x2dc   : > { %1097 = vperm.xlu0 %1481, %v1723_v60  }
 0x2e0   : > { %1109 = vperm.xlu0 %1481, %v1727_v61  }
 0x2e4   : > { %1117 = vperm.xlu0 %1481, %v1735_v0  }
 0x2f2   : > { %847 = vmax.xlane.f32.xlu1 %v1981_v58 }
 0x2f6   : > { %843 = vmax.xlane.f32.xlu1 %v1986_v18 }
 0x307   : > { %1105 = vperm.xlu1 %1482, %v1721_v59  }
 0x30b   : > { %1113 = vperm.xlu1 %1482, %v1731_v63  }
 0x346   : > { %v838_v60 = vpop.xlane.xlu1 %837 }
 0x347   : > { %v851_v61 = vsub.f32 %v1901_v19, %v838_v60  ;;  %v834_v0 = vpop.xlane.xlu0 %833 }
 0x348   : > { %v849_v23 = vsub.f32 %v1909_v27, %v834_v0 }
 0x349   : > { %v861_v24 = vmul.f32 1.442695, %v851_v61 }
 0x34a   : > { %v857_v25 = vmul.f32 1.442695, %v849_v23  ;;  %v840_v26 = vpop.xlane.xlu1 %839 }
 0x34b   : > { %1527 = vpow2.f32 %v861_v24  ;;  %v852_v59 = vsub.f32 %v1923_v36, %v840_v26  ;;  %v836_v63 = vpop.xlane.xlu0 %835 }
 0x34c   : > { %v850_v19 = vsub.f32 %v1928_v39, %v836_v63  ;;  %1529 = vpow2.f32 %v857_v25 }
 0x34d   : > { %v863_v47 = vmul.f32 1.442695, %v852_v59 }
 0x34e   : > { %v1102_v27 = vpop.permute.xlu1 %1101  ;;  %v859_v55 = vmul.f32 1.442695, %v850_v19 }
 0x34f   : > { %1531 = vpow2.f32 %v863_v47  ;;  %v1129_v36 = vsel %vm913_vm8, %v1102_v27, %v1865_v46  ;;  %v846_v57 = vpop.xlane.xlu0 %845 }
 0x350   : > { %v1145_v7 = vadd.f32 %v1919_v34, %v1129_v36  ;;  %v855_v39 = vsub.f32 %v1936_v52, %v846_v57  ;;  %1533 = vpow2.f32 %v859_v55 }
 0x352   : > { %v1187_v8 = vsel %vm2007_vm0, %v1177_v37, %v1145_v7  ;;  %v869_v10 = vmul.f32 1.442695, %v855_v39 }
 0x353   : > { %v2020_v11 = vsel %vm1995_vm14, %v1187_v8, 0.0  ;;  %v842_v5 = vpop.xlane.xlu0 %841 }
 0x354   : > { %1535 = vpow2.f32 %v869_v10  ;;  %v853_v17 = vsub.f32 %v1947_v13, %v842_v5 }
 0x355   : > { %v2023_v21 = vpop.eup %1527 }
 0x356   : > { %v865_v46 = vmul.f32 1.442695, %v853_v17  ;;  %877 = vadd.xlane.f32.xlu0 %v2023_v21  ;;  %v2026_v34 = vpop.eup %1529 }
 0x358   : > { %1537 = vpow2.f32 %v865_v46 }
 0x359   : > { %v2028_v52 = vpop.eup %1531 }
 0x35a   : > { %879 = vadd.xlane.f32.xlu1 %v2028_v52  ;;  %873 = vadd.xlane.f32.xlu0 %v2026_v34  ;;  %v2035_v13 = vpop.eup %1533 }
 0x35b   : > { %v1098_v22 = vpop.permute.xlu0 %1097 }
 0x35c   : > { %v1128_v30 = vsel %vm913_vm8, %v1098_v22, %v1869_v49 }
 0x35d   : > { %v1144_v33 = vadd.f32 %v1912_v28, %v1128_v30 }
 0x35e   : > { %v2038_v37 = vpop.eup %1535  ;;  %875 = vadd.xlane.f32.xlu1 %v2035_v13 }
 0x35f   : > { %v1186_v38 = vsel %vm2007_vm0, %v1957_v32, %v1144_v33  ;;  %885 = vadd.xlane.f32.xlu0 %v2038_v37  ;;  %v1110_v40 = vpop.permute.xlu0 %1109 }
 0x360   : > { %v1196_v42 = vsel %vm1995_vm14, %v1186_v38, 0.0  ;;  %v1131_v49 = vsel %vm913_vm8, %v1110_v40, %v1885_v56 }
 0x361   : > { %v1147_v28 = vadd.f32 %v1915_v31, %v1131_v49 }
 0x362   : > { %v2051_v43 = vpop.eup %1537 }
 0x363   : > { %v1189_v60 = vsel %vm2007_vm0, %v1960_v35, %v1147_v28  ;;  %881 = vadd.xlane.f32.xlu0 %v2051_v43  ;;  %v1118_v32 = vpop.permute.xlu0 %1117 }
 0x364   : > { %v1199_v61 = vsel %vm1995_vm14, %v1189_v60, 0.0  ;;  %v1133_v0 = vsel %vm913_vm8, %v1118_v32, %v1889_v62 }
 0x365   : > { %v1149_v56 = vadd.f32 %v1950_v15, %v1133_v0 }
 0x367   : > { %v1191_v31 = vsel %vm2007_vm0, %v1974_v16, %v1149_v56 }
 0x368   : > { %v2068_v23 = vsel %vm1995_vm14, %v1191_v31, 0.0 }
 0x379   : > { %1125 = vperm.xlu0 %1481, %v1743_v3  }
 0x37f   : > { %v848_v35 = vpop.xlane.xlu1 %847 }
 0x380   : > { %v856_v24 = vsub.f32 %v1981_v58, %v848_v35 }
 0x382   : > { %v871_v25 = vmul.f32 1.442695, %v856_v24 }
 0x383   : > { %v844_v26 = vpop.xlane.xlu1 %843 }
 0x384   : > { %1539 = vpow2.f32 %v871_v25  ;;  %v854_v62 = vsub.f32 %v1986_v18, %v844_v26 }
 0x386   : > { %v867_v59 = vmul.f32 1.442695, %v854_v62 }
 0x387   : > { %v1106_v15 = vpop.permute.xlu1 %1105 }
 0x388   : > { %1541 = vpow2.f32 %v867_v59  ;;  %v1130_v16 = vsel %vm913_vm8, %v1106_v15, %v1877_v53 }
 0x389   : > { %v1146_v63 = vadd.f32 %v1904_v20, %v1130_v16 }
 0x38b   : > { %v1188_v3 = vsel %vm2007_vm0, %v1954_v29, %v1146_v63  ;;  %v1114_v19 = vpop.permute.xlu1 %1113 }
 0x38c   : > { %v1198_v58 = vsel %vm1995_vm14, %v1188_v3, 0.0  ;;  %v1132_v18 = vsel %vm913_vm8, %v1114_v19, %v1873_v50 }
 0x38d   : > { %v1148_v47 = vadd.f32 %v1939_v2, %v1132_v18 }
 0x38e   : > { %v1540_v27 = vpop.eup %1539 }
 0x38f   : > { %v1190_v53 = vsel %vm2007_vm0, %v1968_v14, %v1148_v47  ;;  %887 = vadd.xlane.f32.xlu1 %v1540_v27 }
 0x390   : > { %v1200_v20 = vsel %vm1995_vm14, %v1190_v53, 0.0 }
 0x392   : > { %v1542_v29 = vpop.eup %1541 }
 0x393   : > { %883 = vadd.xlane.f32.xlu1 %v1542_v29 }
 0x3a4   : > { %1121 = vperm.xlu1 %1482, %v1737_v1  }
 0x3e3   : > { %v878_v55 = vpop.xlane.xlu0 %877 }
 0x3e4   : > { %1543 = vrcp.f32 %v878_v55 }
 0x3e7   : > { %v880_v36 = vpop.xlane.xlu1 %879  ;;  %v874_v50 = vpop.xlane.xlu0 %873 }
 0x3e8   : > { %1545 = vrcp.f32 %v880_v36 }
 0x3e9   : > { %1547 = vrcp.f32 %v874_v50 }
 0x3eb   : > { %v876_v2 = vpop.xlane.xlu1 %875 }
 0x3ec   : > { %1549 = vrcp.f32 %v876_v2  ;;  %v886_v57 = vpop.xlane.xlu0 %885 }
 0x3ee   : > { %v1544_v7 = vpop.eup %1543 }
 0x3ef   : > { %v894_v1 = vmul.f32 %v1544_v7, %v2023_v21 }
 0x3f0   : > { %v882_v14 = vpop.xlane.xlu0 %881 }
 0x3f1   : > { %v1206_v39 = vsel %vm798_vm11, %v894_v1, %v1198_v58  ;;  %1551 = vrcp.f32 %v882_v14 }
 0x3f2   : > { %v1546_v8 = vpop.eup %1545  ;;  %1214 = vst [vmem:[%s2097_s12 + $0x10] sm:$0xff] %v1206_v39  ;;  %1553 = vrcp.f32 %v886_v57 }
 0x3f3   : > { %v1548_v10 = vpop.eup %1547  ;;  %v896_v5 = vmul.f32 %v1546_v8, %v2028_v52 }
 0x3f4   : > { %v890_v17 = vmul.f32 %v1548_v10, %v2026_v34 }
 0x3f5   : > { %v1207_v46 = vsel %vm798_vm11, %v896_v5, %v1199_v61 }
 0x3f6   : > { %v1550_v22 = vpop.eup %1549  ;;  %1215 = vst [vmem:[%s2097_s12 + $0x18] sm:$0xff] %v1207_v46  ;;  %v1204_v21 = vsel %vm798_vm11, %v890_v17, %v1196_v42 }
 0x3f7   : > { %1212 = vst [vmem:[%s2097_s12] sm:$0xff] %v1204_v21  ;;  %v892_v30 = vmul.f32 %v1550_v22, %v2035_v13 }
 0x3f8   : > { %v1126_v33 = vpop.permute.xlu0 %1125 }
 0x3f9   : > { %v1205_v38 = vsel %vm798_vm11, %v892_v30, %v2020_v11  ;;  %v1135_v34 = vsel %vm913_vm8, %v1126_v33, %v1893_v4 }
 0x3fa   : > { %1213 = vst [vmem:[%s2097_s12 + $0x8] sm:$0xff] %v1205_v38  ;;  %v1151_v52 = vadd.f32 %v1942_v9, %v1135_v34 }
 0x3fb   : > { %v1552_v40 = vpop.eup %1551 }
 0x3fc   : > { %v898_v49 = vmul.f32 %v1552_v40, %v2051_v43  ;;  %v1193_v42 = vsel %vm2007_vm0, %v1971_v12, %v1151_v52  ;;  %v1554_v43 = vpop.eup %1553 }
 0x3fd   : > { %v1203_v13 = vsel %vm1995_vm14, %v1193_v42, 0.0  ;;  %v902_v61 = vmul.f32 %v1554_v43, %v2038_v37 }
 0x3fe   : > { %v1208_v11 = vsel %vm798_vm11, %v898_v49, %v1200_v20 }
 0x3ff   : > { %1216 = vst [vmem:[%s2097_s12 + $0x20] sm:$0xff] %v1208_v11 }
 0x41c   : > { %v888_v28 = vpop.xlane.xlu1 %887 }
 0x41d   : > { %1555 = vrcp.f32 %v888_v28 }
 0x420   : > { %v884_v4 = vpop.xlane.xlu1 %883 }
 0x421   : > { %1557 = vrcp.f32 %v884_v4 }
 0x424   : > { %v1122_v9 = vpop.permute.xlu1 %1121 }
 0x425   : > { %v1134_v12 = vsel %vm913_vm8, %v1122_v9, %v1881_v54 }
 0x426   : > { %v1150_v60 = vadd.f32 %v1932_v51, %v1134_v12 }
 0x427   : > { %v1556_v32 = vpop.eup %1555 }
 0x428   : > { %v904_v0 = vmul.f32 %v1556_v32, %v1540_v27  ;;  %v1192_v56 = vsel %vm2007_vm0, %v1965_v41, %v1150_v60 }
 0x429   : > { %v1202_v31 = vsel %vm1995_vm14, %v1192_v56, 0.0 }
 0x42a   : > { %v1211_v35 = vsel %vm798_vm11, %v904_v0, %v1203_v13  ;;  %v1210_v45 = vsel %vm798_vm11, %v902_v61, %v1202_v31 }
 0x42b   : > { %v1558_v54 = vpop.eup %1557  ;;  %1219 = vst [vmem:[%s2097_s12 + $0x38] sm:$0xff] %v1211_v35  ;;  %1218 = vst [vmem:[%s2097_s12 + $0x30] sm:$0xff] %v1210_v45 }
 0x42c   : > { %v900_v51 = vmul.f32 %v1558_v54, %v1542_v29 }
 0x42e   : > { %v1209_v37 = vsel %vm798_vm11, %v900_v51, %v2068_v23 }
 0x42f   : > { %1217 = vst [vmem:[%s2097_s12 + $0x28] sm:$0xff] %v1209_v37 }
 0x430 PF: > { %s18_s27 = sadd.s32 1, %s1565_s27  }
 0x431   : > { %p15_p4 = scmp.ge.s32.totalorder %s18_s27, 4  }
 0x433   :  { %17 = sbr.rel (!%p15_p4) target bundleno = 1 (0x1), region = 85 }

</bundles_post_ra>
